<compile_context>
chip_gen: v7x
topology: tpu7x:2x2x1
jax: 0.10.0
libtpu: 0.0.40
codegen_flags: <defaults>
</compile_context>

<pallas_src>
import functools

import jax
import jax.numpy as jnp
from jax.experimental import pallas as pl
from jax.experimental.pallas import tpu as pltpu

LN_EPS = 1e-5        # nn.LayerNorm default
LEAKY_SLOPE = 0.1    # nn.LeakyReLU(0.1)


def _layernorm(x, gamma, beta):
    mean = jnp.mean(x, axis=-1, keepdims=True)
    var = jnp.mean((x - mean) ** 2, axis=-1, keepdims=True)   # biased var (matches PyTorch)
    return (x - mean) * jax.lax.rsqrt(var + LN_EPS) * gamma + beta


def _leaky_relu(x):
    return jnp.where(x > 0, x, LEAKY_SLOPE * x)


def _pick_hw_tile(hw, c, itemsize, budget_bytes):
    """Largest multiple-of-128 tile that divides HW and fits a per-buffer VMEM budget."""
    if hw % 128 != 0:
        # TODO(synk): mask/pad ragged spatial tiles; for now fall back to one full-HW block.
        return hw
    cap = max(128, (budget_bytes // (c * itemsize)) // 128 * 128)
    best = 128
    t = 128
    limit = min(hw, cap)
    while t <= limit:
        if hw % t == 0:
            best = t
        t += 128
    return best


def mlp_ffn_neck(x_nchw, params, *, hw_tile=None, vmem_budget_bytes=4 * 1024 * 1024):
    """Forward pass of MLPFFNNeck (num_layers=3). params weights are stored [in, out]."""
    B, C, H, W = x_nchw.shape
    HW = H * W
    hidden = params["w1"].shape[1]
    out_ch = params["w3"].shape[1]

    # NCHW -> [B, C, HW]: contiguous reshape, no transpose, no extra HBM pass.
    x = x_nchw.reshape(B, C, HW)

    if hw_tile is None:
        hw_tile = _pick_hw_tile(HW, C, x.dtype.itemsize, vmem_budget_bytes)
    assert HW % hw_tile == 0, "hw_tile must divide H*W exactly"
    nh = HW // hw_tile
    chunk = 128 if hw_tile % 128 == 0 else hw_tile
    n_chunks = hw_tile // chunk
    inv_hw = 1.0 / float(HW)

    def kernel(x_ref,
               w1_ref, b1_ref, g1_ref, be1_ref,
               w2_ref, b2_ref, g2_ref, be2_ref,
               w3_ref, wffn_ref,
               main_ref, res_ref, out_ref,
               acc_ref):
        h_idx = pl.program_id(1)

        # --- init accumulator on first spatial step of this batch element ---
        @pl.when(h_idx == 0)
        def _init():
            acc_ref[...] = jnp.zeros_like(acc_ref)

        # --- streaming pooling: pure VALU adds per 128-lane chunk, cast per chunk ---
        psum = x_ref[:, :, 0:chunk].astype(jnp.float32)
        for j in range(1, n_chunks):
            psum = psum + x_ref[:, :, j * chunk:(j + 1) * chunk].astype(jnp.float32)
        acc_ref[...] += psum                                   # [1, C, chunk] f32

        # --- epilogue: mean, tiny MLP + FFN, residual add, stores (last step only) ---
        @pl.when(h_idx == nh - 1)
        def _epilogue():
            pooled = jnp.sum(acc_ref[...], axis=-1) * inv_hw   # [1, C], single XLU reduce
            identity = pooled

            h1 = jnp.dot(pooled, w1_ref[...].astype(jnp.float32),
                         preferred_element_type=jnp.float32) + b1_ref[...]
            h1 = _leaky_relu(_layernorm(h1, g1_ref[...], be1_ref[...]))

            h2 = jnp.dot(h1, w2_ref[...].astype(jnp.float32),
                         preferred_element_type=jnp.float32) + b2_ref[...]
            h2 = _leaky_relu(_layernorm(h2, g2_ref[...], be2_ref[...]))

            main = jnp.dot(h2, w3_ref[...].astype(jnp.float32),
                           preferred_element_type=jnp.float32)
            res = jnp.dot(identity, wffn_ref[...].astype(jnp.float32),
                          preferred_element_type=jnp.float32)

            main_ref[...] = main[:, None, :].astype(main_ref.dtype)
            res_ref[...] = res[:, None, :].astype(res_ref.dtype)
            out_ref[...] = (main + res)[:, None, :].astype(out_ref.dtype)

    def full2d(shape):
        return pl.BlockSpec(shape, lambda b, h: (0, 0))

    in_specs = [
        pl.BlockSpec((1, C, hw_tile), lambda b, h: (b, 0, h)),   # streamed feature map
        full2d(params["w1"].shape), full2d(params["b1"].shape),
        full2d(params["g1"].shape), full2d(params["be1"].shape),
        full2d(params["w2"].shape), full2d(params["b2"].shape),
        full2d(params["g2"].shape), full2d(params["be2"].shape),
        full2d(params["w3"].shape), full2d(params["wffn"].shape),
    ]
    out_specs = [pl.BlockSpec((1, 1, out_ch), lambda b, h: (b, 0, 0))] * 3
    out_shapes = [jax.ShapeDtypeStruct((B, 1, out_ch), jnp.float32)] * 3

    # Advisory cost estimate: bandwidth-bound pooling + tiny MLP.
    flops = int(B * HW * C + 2 * B * (C * hidden + hidden * hidden
                                      + hidden * out_ch + C * out_ch))
    bytes_accessed = int(x.size * x.dtype.itemsize
                         + sum(int(v.size) * v.dtype.itemsize for v in params.values())
                         + 3 * B * out_ch * 4)
    cost = pl.CostEstimate(flops=flops, transcendentals=0, bytes_accessed=bytes_accessed)

    main, res, out = pl.pallas_call(
        kernel,
        out_shape=out_shapes,
        grid_spec=pltpu.PrefetchScalarGridSpec(
            num_scalar_prefetch=0,
            grid=(B, nh),
            in_specs=in_specs,
            out_specs=out_specs,
            scratch_shapes=[pltpu.VMEM((1, C, chunk), jnp.float32)],
        ),
        compiler_params=pltpu.CompilerParams(
            dimension_semantics=("parallel", "arbitrary"),   # B across TCs, HW = reduction
            vmem_limit_bytes=48 * 1024 * 1024,
        ),
        cost_estimate=cost,
    )(x,
      params["w1"], params["b1"], params["g1"], params["be1"],
      params["w2"], params["b2"], params["g2"], params["be2"],
      params["w3"], params["wffn"])

    return {"main": main.reshape(B, out_ch),
            "residual": res.reshape(B, out_ch),
            "out": out.reshape(B, out_ch)}


def init_params(key, in_channels, out_channels):
    hidden = in_channels * 2
    keys = jax.random.split(key, 6)

    def linear_w(k, fan_in, fan_out):
        bound = 1.0 / jnp.sqrt(fan_in)
        return jax.random.uniform(k, (fan_in, fan_out), jnp.float32, -bound, bound)

    def linear_b(k, fan_in, fan_out):
        bound = 1.0 / jnp.sqrt(fan_in)
        return jax.random.uniform(k, (1, fan_out), jnp.float32, -bound, bound)

    return {
        "w1": linear_w(keys[0], in_channels, hidden),
        "b1": linear_b(keys[1], in_channels, hidden),
        "g1": jnp.ones((1, hidden), jnp.float32),
        "be1": jnp.zeros((1, hidden), jnp.float32),
        "w2": linear_w(keys[2], hidden, hidden),
        "b2": linear_b(keys[3], hidden, hidden),
        "g2": jnp.ones((1, hidden), jnp.float32),
        "be2": jnp.zeros((1, hidden), jnp.float32),
        "w3": linear_w(keys[4], hidden, out_channels),          # bias=False
        "wffn": linear_w(keys[5], in_channels, out_channels),   # bias=False
    }


def cast_matmul_weights(params, dtype=jnp.bfloat16):
    """Halve weight DMA/VMEM: store matmul weights in bf16 (upcast to f32 in-kernel)."""
    p = dict(params)
    for k in ("w1", "w2", "w3", "wffn"):
        p[k] = p[k].astype(dtype)
    return p


def reference_forward(x_nchw, params):
    """Pure-JAX reference mirroring the PyTorch module (all math in f32)."""
    p = {k: v.astype(jnp.float32) for k, v in params.items()}
    B, C, H, W = x_nchw.shape
    pooled = jnp.mean(x_nchw.astype(jnp.float32).reshape(B, C, H * W), axis=-1)
    identity = pooled
    h = pooled @ p["w1"] + p["b1"]
    h = _leaky_relu(_layernorm(h, p["g1"], p["be1"]))
    h = h @ p["w2"] + p["b2"]
    h = _leaky_relu(_layernorm(h, p["g2"], p["be2"]))
    main = h @ p["w3"]
    res = identity @ p["wffn"]
    return {"main": main, "residual": res, "out": main + res}


def _check(outputs, ref, tag):
    for k in ("main", "residual", "out"):
        assert jnp.allclose(outputs[k], ref[k], atol=2e-4, rtol=2e-4), f"mismatch in {k} ({tag})"


if __name__ == "__main__":
    key = jax.random.PRNGKey(0)
    kx1, kp1, kx2, kp2 = jax.random.split(key, 4)

    # Case 1: B=2, C=64, out=64, 16x16 spatial (auto tile -> single 256-wide tile, 2 chunks).
    B, C, H, W, OUT = 2, 64, 16, 16, 64
    x = jax.random.normal(kx1, (B, C, H, W), jnp.float32)        # PyTorch NCHW input
    params = cast_matmul_weights(init_params(kp1, C, OUT))
    out1 = mlp_ffn_neck(x, params)
    jax.block_until_ready(out1["out"])
    _check(out1, reference_forward(x, params), "auto-tile")

    # Case 2: same input, forced hw_tile=128 -> 2 spatial grid steps (exercises the
    # pl.when init / accumulate / epilogue streaming path).
    out2 = mlp_ffn_neck(x, params, hw_tile=128)
    jax.block_until_ready(out2["out"])
    _check(out2, reference_forward(x, params), "streamed")

    # Case 3: ragged spatial (HW not a multiple of 128) + in_channels != out_channels.
    B3, C3, H3, W3, OUT3 = 2, 32, 6, 6, 48
    x3 = jax.random.normal(kx2, (B3, C3, H3, W3), jnp.float32)
    params3 = cast_matmul_weights(init_params(kp2, C3, OUT3))
    out3 = mlp_ffn_neck(x3, params3)
    jax.block_until_ready(out3["out"])
    _check(out3, reference_forward(x3, params3), "ragged-hw")

    print("KERNEL_OK")
</pallas_src>

<mosaic_0001>
module attributes {stable_mosaic.version = 11 : i64} {
  func.func @kernel(%arg0: i32, %arg1: i32, %arg2: memref<1x64x256xf32, #tpu.memory_space<vmem>>, %arg3: memref<64x128xbf16, #tpu.memory_space<vmem>>, %arg4: memref<1x128xf32, #tpu.memory_space<vmem>>, %arg5: memref<1x128xf32, #tpu.memory_space<vmem>>, %arg6: memref<1x128xf32, #tpu.memory_space<vmem>>, %arg7: memref<128x128xbf16, #tpu.memory_space<vmem>>, %arg8: memref<1x128xf32, #tpu.memory_space<vmem>>, %arg9: memref<1x128xf32, #tpu.memory_space<vmem>>, %arg10: memref<1x128xf32, #tpu.memory_space<vmem>>, %arg11: memref<128x64xbf16, #tpu.memory_space<vmem>>, %arg12: memref<64x64xbf16, #tpu.memory_space<vmem>>, %arg13: memref<1x1x64xf32, #tpu.memory_space<vmem>>, %arg14: memref<1x1x64xf32, #tpu.memory_space<vmem>>, %arg15: memref<1x1x64xf32, #tpu.memory_space<vmem>>, %arg16: memref<1x64x128xf32, #tpu.memory_space<vmem>>) attributes {dimension_semantics = [#tpu.dimension_semantics<parallel>, #tpu.dimension_semantics<arbitrary>], iteration_bounds = array<i64: 2, 1>, scalar_prefetch = 0 : i64, scratch_operands = 1 : i64, tpu.core_type = #tpu.core_type<tc>, window_params = [{transform_indices = @transform_0, window_bounds = array<i64: 1, 64, 256>}, {pipeline_mode = #tpu.pipeline_mode<synchronous>, transform_indices = @transform_1, window_bounds = array<i64: 64, 128>}, {pipeline_mode = #tpu.pipeline_mode<synchronous>, transform_indices = @transform_2, window_bounds = array<i64: 1, 128>}, {pipeline_mode = #tpu.pipeline_mode<synchronous>, transform_indices = @transform_3, window_bounds = array<i64: 1, 128>}, {pipeline_mode = #tpu.pipeline_mode<synchronous>, transform_indices = @transform_4, window_bounds = array<i64: 1, 128>}, {pipeline_mode = #tpu.pipeline_mode<synchronous>, transform_indices = @transform_5, window_bounds = array<i64: 128, 128>}, {pipeline_mode = #tpu.pipeline_mode<synchronous>, transform_indices = @transform_6, window_bounds = array<i64: 1, 128>}, {pipeline_mode = #tpu.pipeline_mode<synchronous>, transform_indices = @transform_7, window_bounds = array<i64: 1, 128>}, {pipeline_mode = #tpu.pipeline_mode<synchronous>, transform_indices = @transform_8, window_bounds = array<i64: 1, 128>}, {pipeline_mode = #tpu.pipeline_mode<synchronous>, transform_indices = @transform_9, window_bounds = array<i64: 128, 64>}, {pipeline_mode = #tpu.pipeline_mode<synchronous>, transform_indices = @transform_10, window_bounds = array<i64: 64, 64>}, {transform_indices = @transform_11, window_bounds = array<i64: 1, 1, 64>}, {transform_indices = @transform_12, window_bounds = array<i64: 1, 1, 64>}, {transform_indices = @transform_13, window_bounds = array<i64: 1, 1, 64>}]} {
    %c0_i32 = arith.constant 0 : i32
    %0 = arith.cmpi eq, %arg1, %c0_i32 : i32
    %1 = arith.extui %0 : i1 to i32
    %c0_i32_0 = arith.constant 0 : i32
    %2 = arith.cmpi ne, %1, %c0_i32_0 : i32
    scf.if %2 {
      %cst = arith.constant 0.000000e+00 : f32
      %12 = vector.broadcast %cst : f32 to vector<1x64x128xf32>
      %c0_13 = arith.constant 0 : index
      %c0_14 = arith.constant 0 : index
      %c0_15 = arith.constant 0 : index
      %13 = vector.load %arg16[%c0_13, %c0_14, %c0_15] : memref<1x64x128xf32, #tpu.memory_space<vmem>>, vector<1x64x128xf32>
      tpu.vector_store %arg16[%c0_13, %c0_14, %c0_15], %12 {strides = array<i32>} : memref<1x64x128xf32, #tpu.memory_space<vmem>>, vector<1x64x128xf32>,
    } else {
    }
    %c0 = arith.constant 0 : index
    %c0_1 = arith.constant 0 : index
    %c0_2 = arith.constant 0 : index
    %3 = vector.load %arg2[%c0, %c0_1, %c0_2] : memref<1x64x256xf32, #tpu.memory_space<vmem>>, vector<1x64x128xf32>
    %c0_3 = arith.constant 0 : index
    %c0_4 = arith.constant 0 : index
    %c128 = arith.constant 128 : index
    %4 = vector.load %arg2[%c0_3, %c0_4, %c128] : memref<1x64x256xf32, #tpu.memory_space<vmem>>, vector<1x64x128xf32>
    %5 = arith.addf %3, %4 : vector<1x64x128xf32>
    %c0_5 = arith.constant 0 : index
    %c0_6 = arith.constant 0 : index
    %c0_7 = arith.constant 0 : index
    %6 = vector.load %arg16[%c0_5, %c0_6, %c0_7] : memref<1x64x128xf32, #tpu.memory_space<vmem>>, vector<1x64x128xf32>
    %7 = arith.addf %6, %5 : vector<1x64x128xf32>
    %c0_8 = arith.constant 0 : index
    %c0_9 = arith.constant 0 : index
    %c0_10 = arith.constant 0 : index
    %8 = vector.load %arg16[%c0_8, %c0_9, %c0_10] : memref<1x64x128xf32, #tpu.memory_space<vmem>>, vector<1x64x128xf32>
    tpu.vector_store %arg16[%c0_8, %c0_9, %c0_10], %7 {strides = array<i32>} : memref<1x64x128xf32, #tpu.memory_space<vmem>>, vector<1x64x128xf32>,
    %c0_i32_11 = arith.constant 0 : i32
    %9 = arith.cmpi eq, %arg1, %c0_i32_11 : i32
    %10 = arith.extui %9 : i1 to i32
    %c0_i32_12 = arith.constant 0 : i32
    %11 = arith.cmpi ne, %10, %c0_i32_12 : i32
    scf.if %11 {
      %c0_13 = arith.constant 0 : index
      %c0_14 = arith.constant 0 : index
      %c0_15 = arith.constant 0 : index
      %12 = vector.load %arg16[%c0_13, %c0_14, %c0_15] : memref<1x64x128xf32, #tpu.memory_space<vmem>>, vector<1x64x128xf32>
      %cst = arith.constant dense<0.000000e+00> : vector<1x64xf32>
      %13 = vector.multi_reduction <add>, %12, %cst [2] : vector<1x64x128xf32> to vector<1x64xf32>
      %cst_16 = arith.constant 3.906250e-03 : f32
      %14 = vector.broadcast %cst_16 : f32 to vector<1x64xf32>
      %15 = arith.mulf %13, %14 : vector<1x64xf32>
      %c0_17 = arith.constant 0 : index
      %c0_18 = arith.constant 0 : index
      %16 = vector.load %arg3[%c0_17, %c0_18] : memref<64x128xbf16, #tpu.memory_space<vmem>>, vector<64x128xbf16>
      %17 = arith.extf %16 : vector<64x128xbf16> to vector<64x128xf32>
      %cst_19 = arith.constant dense<0.000000e+00> : vector<1x128xf32>
      %18 = tpu.matmul %15, %17, %cst_19 {dimension_numbers = #tpu.dot_dimension_numbers<[1], [0], [0], [1], [0, 0, 1, 1], [], []>} : vector<1x64xf32>, vector<64x128xf32>, vector<1x128xf32> -> vector<1x128xf32>
      %c0_20 = arith.constant 0 : index
      %c0_21 = arith.constant 0 : index
      %19 = vector.load %arg4[%c0_20, %c0_21] : memref<1x128xf32, #tpu.memory_space<vmem>>, vector<1x128xf32>
      %20 = arith.addf %18, %19 : vector<1x128xf32>
      %c0_22 = arith.constant 0 : index
      %c0_23 = arith.constant 0 : index
      %21 = vector.load %arg5[%c0_22, %c0_23] : memref<1x128xf32, #tpu.memory_space<vmem>>, vector<1x128xf32>
      %c0_24 = arith.constant 0 : index
      %c0_25 = arith.constant 0 : index
      %22 = vector.load %arg6[%c0_24, %c0_25] : memref<1x128xf32, #tpu.memory_space<vmem>>, vector<1x128xf32>
      %cst_26 = arith.constant dense<0.000000e+00> : vector<1xf32>
      %23 = vector.multi_reduction <add>, %20, %cst_26 [1] : vector<1x128xf32> to vector<1xf32>
      %24 = vector.shape_cast %23 : vector<1xf32> to vector<1x1xf32>
      %cst_27 = arith.constant 1.280000e+02 : f32
      %25 = vector.broadcast %cst_27 : f32 to vector<1x1xf32>
      %26 = arith.divf %24, %25 : vector<1x1xf32>
      %27 = vector.broadcast %26 : vector<1x1xf32> to vector<1x128xf32>
      %28 = arith.subf %20, %27 : vector<1x128xf32>
      %29 = arith.mulf %28, %28 : vector<1x128xf32>
      %cst_28 = arith.constant dense<0.000000e+00> : vector<1xf32>
      %30 = vector.multi_reduction <add>, %29, %cst_28 [1] : vector<1x128xf32> to vector<1xf32>
      %31 = vector.shape_cast %30 : vector<1xf32> to vector<1x1xf32>
      %cst_29 = arith.constant 1.280000e+02 : f32
      %32 = vector.broadcast %cst_29 : f32 to vector<1x1xf32>
      %33 = arith.divf %31, %32 : vector<1x1xf32>
      %34 = vector.broadcast %26 : vector<1x1xf32> to vector<1x128xf32>
      %35 = arith.subf %20, %34 : vector<1x128xf32>
      %cst_30 = arith.constant 9.99999974E-6 : f32
      %36 = vector.broadcast %cst_30 : f32 to vector<1x1xf32>
      %37 = arith.addf %33, %36 : vector<1x1xf32>
      %38 = math.rsqrt %37 : vector<1x1xf32>
      %39 = vector.broadcast %38 : vector<1x1xf32> to vector<1x128xf32>
      %40 = arith.mulf %35, %39 : vector<1x128xf32>
      %41 = arith.mulf %40, %21 : vector<1x128xf32>
      %42 = arith.addf %41, %22 : vector<1x128xf32>
      %cst_31 = arith.constant 0.000000e+00 : f32
      %43 = vector.broadcast %cst_31 : f32 to vector<1x128xf32>
      %44 = arith.cmpf ogt, %42, %43 : vector<1x128xf32>
      %cst_32 = arith.constant 1.000000e-01 : f32
      %45 = vector.broadcast %cst_32 : f32 to vector<1x128xf32>
      %46 = arith.mulf %45, %42 : vector<1x128xf32>
      %47 = arith.select %44, %42, %46 : vector<1x128xi1>, vector<1x128xf32>
      %c0_33 = arith.constant 0 : index
      %c0_34 = arith.constant 0 : index
      %48 = vector.load %arg7[%c0_33, %c0_34] : memref<128x128xbf16, #tpu.memory_space<vmem>>, vector<128x128xbf16>
      %49 = arith.extf %48 : vector<128x128xbf16> to vector<128x128xf32>
      %cst_35 = arith.constant dense<0.000000e+00> : vector<1x128xf32>
      %50 = tpu.matmul %47, %49, %cst_35 {dimension_numbers = #tpu.dot_dimension_numbers<[1], [0], [0], [1], [0, 0, 1, 1], [], []>} : vector<1x128xf32>, vector<128x128xf32>, vector<1x128xf32> -> vector<1x128xf32>
      %c0_36 = arith.constant 0 : index
      %c0_37 = arith.constant 0 : index
      %51 = vector.load %arg8[%c0_36, %c0_37] : memref<1x128xf32, #tpu.memory_space<vmem>>, vector<1x128xf32>
      %52 = arith.addf %50, %51 : vector<1x128xf32>
      %c0_38 = arith.constant 0 : index
      %c0_39 = arith.constant 0 : index
      %53 = vector.load %arg9[%c0_38, %c0_39] : memref<1x128xf32, #tpu.memory_space<vmem>>, vector<1x128xf32>
      %c0_40 = arith.constant 0 : index
      %c0_41 = arith.constant 0 : index
      %54 = vector.load %arg10[%c0_40, %c0_41] : memref<1x128xf32, #tpu.memory_space<vmem>>, vector<1x128xf32>
      %cst_42 = arith.constant dense<0.000000e+00> : vector<1xf32>
      %55 = vector.multi_reduction <add>, %52, %cst_42 [1] : vector<1x128xf32> to vector<1xf32>
      %56 = vector.shape_cast %55 : vector<1xf32> to vector<1x1xf32>
      %cst_43 = arith.constant 1.280000e+02 : f32
      %57 = vector.broadcast %cst_43 : f32 to vector<1x1xf32>
      %58 = arith.divf %56, %57 : vector<1x1xf32>
      %59 = vector.broadcast %58 : vector<1x1xf32> to vector<1x128xf32>
      %60 = arith.subf %52, %59 : vector<1x128xf32>
      %61 = arith.mulf %60, %60 : vector<1x128xf32>
      %cst_44 = arith.constant dense<0.000000e+00> : vector<1xf32>
      %62 = vector.multi_reduction <add>, %61, %cst_44 [1] : vector<1x128xf32> to vector<1xf32>
      %63 = vector.shape_cast %62 : vector<1xf32> to vector<1x1xf32>
      %cst_45 = arith.constant 1.280000e+02 : f32
      %64 = vector.broadcast %cst_45 : f32 to vector<1x1xf32>
      %65 = arith.divf %63, %64 : vector<1x1xf32>
      %66 = vector.broadcast %58 : vector<1x1xf32> to vector<1x128xf32>
      %67 = arith.subf %52, %66 : vector<1x128xf32>
      %cst_46 = arith.constant 9.99999974E-6 : f32
      %68 = vector.broadcast %cst_46 : f32 to vector<1x1xf32>
      %69 = arith.addf %65, %68 : vector<1x1xf32>
      %70 = math.rsqrt %69 : vector<1x1xf32>
      %71 = vector.broadcast %70 : vector<1x1xf32> to vector<1x128xf32>
      %72 = arith.mulf %67, %71 : vector<1x128xf32>
      %73 = arith.mulf %72, %53 : vector<1x128xf32>
      %74 = arith.addf %73, %54 : vector<1x128xf32>
      %cst_47 = arith.constant 0.000000e+00 : f32
      %75 = vector.broadcast %cst_47 : f32 to vector<1x128xf32>
      %76 = arith.cmpf ogt, %74, %75 : vector<1x128xf32>
      %cst_48 = arith.constant 1.000000e-01 : f32
      %77 = vector.broadcast %cst_48 : f32 to vector<1x128xf32>
      %78 = arith.mulf %77, %74 : vector<1x128xf32>
      %79 = arith.select %76, %74, %78 : vector<1x128xi1>, vector<1x128xf32>
      %c0_49 = arith.constant 0 : index
      %c0_50 = arith.constant 0 : index
      %80 = vector.load %arg11[%c0_49, %c0_50] : memref<128x64xbf16, #tpu.memory_space<vmem>>, vector<128x64xbf16>
      %81 = arith.extf %80 : vector<128x64xbf16> to vector<128x64xf32>
      %cst_51 = arith.constant dense<0.000000e+00> : vector<1x64xf32>
      %82 = tpu.matmul %79, %81, %cst_51 {dimension_numbers = #tpu.dot_dimension_numbers<[1], [0], [0], [1], [0, 0, 1, 1], [], []>} : vector<1x128xf32>, vector<128x64xf32>, vector<1x64xf32> -> vector<1x64xf32>
      %c0_52 = arith.constant 0 : index
      %c0_53 = arith.constant 0 : index
      %83 = vector.load %arg12[%c0_52, %c0_53] : memref<64x64xbf16, #tpu.memory_space<vmem>>, vector<64x64xbf16>
      %84 = arith.extf %83 : vector<64x64xbf16> to vector<64x64xf32>
      %cst_54 = arith.constant dense<0.000000e+00> : vector<1x64xf32>
      %85 = tpu.matmul %15, %84, %cst_54 {dimension_numbers = #tpu.dot_dimension_numbers<[1], [0], [0], [1], [0, 0, 1, 1], [], []>} : vector<1x64xf32>, vector<64x64xf32>, vector<1x64xf32> -> vector<1x64xf32>
      %86 = vector.shape_cast %82 : vector<1x64xf32> to vector<1x1x64xf32>
      %c0_55 = arith.constant 0 : index
      %c0_56 = arith.constant 0 : index
      %c0_57 = arith.constant 0 : index
      %87 = vector.load %arg13[%c0_55, %c0_56, %c0_57] : memref<1x1x64xf32, #tpu.memory_space<vmem>>, vector<1x1x64xf32>
      tpu.vector_store %arg13[%c0_55, %c0_56, %c0_57], %86 {strides = array<i32>} : memref<1x1x64xf32, #tpu.memory_space<vmem>>, vector<1x1x64xf32>,
      %88 = vector.shape_cast %85 : vector<1x64xf32> to vector<1x1x64xf32>
      %c0_58 = arith.constant 0 : index
      %c0_59 = arith.constant 0 : index
      %c0_60 = arith.constant 0 : index
      %89 = vector.load %arg14[%c0_58, %c0_59, %c0_60] : memref<1x1x64xf32, #tpu.memory_space<vmem>>, vector<1x1x64xf32>
      tpu.vector_store %arg14[%c0_58, %c0_59, %c0_60], %88 {strides = array<i32>} : memref<1x1x64xf32, #tpu.memory_space<vmem>>, vector<1x1x64xf32>,
      %90 = arith.addf %82, %85 : vector<1x64xf32>
      %91 = vector.shape_cast %90 : vector<1x64xf32> to vector<1x1x64xf32>
      %c0_61 = arith.constant 0 : index
      %c0_62 = arith.constant 0 : index
      %c0_63 = arith.constant 0 : index
      %92 = vector.load %arg15[%c0_61, %c0_62, %c0_63] : memref<1x1x64xf32, #tpu.memory_space<vmem>>, vector<1x1x64xf32>
      tpu.vector_store %arg15[%c0_61, %c0_62, %c0_63], %91 {strides = array<i32>} : memref<1x1x64xf32, #tpu.memory_space<vmem>>, vector<1x1x64xf32>,
    } else {
    }
    return
  }
  func.func @transform_0(%arg0: i32, %arg1: i32) -> (i32, i32, i32) {
    %c0_i32 = arith.constant 0 : i32
    %c0_i32_0 = arith.constant 0 : i32
    return %arg0, %c0_i32, %arg1 : i32, i32, i32
  }
  func.func @transform_1(%arg0: i32, %arg1: i32) -> (i32, i32) {
    %c0_i32 = arith.constant 0 : i32
    %c0_i32_0 = arith.constant 0 : i32
    %c0_i32_1 = arith.constant 0 : i32
    return %c0_i32, %c0_i32_0 : i32, i32
  }
  func.func @transform_2(%arg0: i32, %arg1: i32) -> (i32, i32) {
    %c0_i32 = arith.constant 0 : i32
    %c0_i32_0 = arith.constant 0 : i32
    %c0_i32_1 = arith.constant 0 : i32
    return %c0_i32, %c0_i32_0 : i32, i32
  }
  func.func @transform_3(%arg0: i32, %arg1: i32) -> (i32, i32) {
    %c0_i32 = arith.constant 0 : i32
    %c0_i32_0 = arith.constant 0 : i32
    %c0_i32_1 = arith.constant 0 : i32
    return %c0_i32, %c0_i32_0 : i32, i32
  }
  func.func @transform_4(%arg0: i32, %arg1: i32) -> (i32, i32) {
    %c0_i32 = arith.constant 0 : i32
    %c0_i32_0 = arith.constant 0 : i32
    %c0_i32_1 = arith.constant 0 : i32
    return %c0_i32, %c0_i32_0 : i32, i32
  }
  func.func @transform_5(%arg0: i32, %arg1: i32) -> (i32, i32) {
    %c0_i32 = arith.constant 0 : i32
    %c0_i32_0 = arith.constant 0 : i32
    %c0_i32_1 = arith.constant 0 : i32
    return %c0_i32, %c0_i32_0 : i32, i32
  }
  func.func @transform_6(%arg0: i32, %arg1: i32) -> (i32, i32) {
    %c0_i32 = arith.constant 0 : i32
    %c0_i32_0 = arith.constant 0 : i32
    %c0_i32_1 = arith.constant 0 : i32
    return %c0_i32, %c0_i32_0 : i32, i32
  }
  func.func @transform_7(%arg0: i32, %arg1: i32) -> (i32, i32) {
    %c0_i32 = arith.constant 0 : i32
    %c0_i32_0 = arith.constant 0 : i32
    %c0_i32_1 = arith.constant 0 : i32
    return %c0_i32, %c0_i32_0 : i32, i32
  }
  func.func @transform_8(%arg0: i32, %arg1: i32) -> (i32, i32) {
    %c0_i32 = arith.constant 0 : i32
    %c0_i32_0 = arith.constant 0 : i32
    %c0_i32_1 = arith.constant 0 : i32
    return %c0_i32, %c0_i32_0 : i32, i32
  }
  func.func @transform_9(%arg0: i32, %arg1: i32) -> (i32, i32) {
    %c0_i32 = arith.constant 0 : i32
    %c0_i32_0 = arith.constant 0 : i32
    %c0_i32_1 = arith.constant 0 : i32
    return %c0_i32, %c0_i32_0 : i32, i32
  }
  func.func @transform_10(%arg0: i32, %arg1: i32) -> (i32, i32) {
    %c0_i32 = arith.constant 0 : i32
    %c0_i32_0 = arith.constant 0 : i32
    %c0_i32_1 = arith.constant 0 : i32
    return %c0_i32, %c0_i32_0 : i32, i32
  }
  func.func @transform_11(%arg0: i32, %arg1: i32) -> (i32, i32, i32) {
    %c0_i32 = arith.constant 0 : i32
    %c0_i32_0 = arith.constant 0 : i32
    %c0_i32_1 = arith.constant 0 : i32
    return %arg0, %c0_i32, %c0_i32_0 : i32, i32, i32
  }
  func.func @transform_12(%arg0: i32, %arg1: i32) -> (i32, i32, i32) {
    %c0_i32 = arith.constant 0 : i32
    %c0_i32_0 = arith.constant 0 : i32
    %c0_i32_1 = arith.constant 0 : i32
    return %arg0, %c0_i32, %c0_i32_0 : i32, i32, i32
  }
  func.func @transform_13(%arg0: i32, %arg1: i32) -> (i32, i32, i32) {
    %c0_i32 = arith.constant 0 : i32
    %c0_i32_0 = arith.constant 0 : i32
    %c0_i32_1 = arith.constant 0 : i32
    return %arg0, %c0_i32, %c0_i32_0 : i32, i32, i32
  }
}

</mosaic_0001>

<bundles_post_ra>
// kernel: tpu_custom_call.1
= control target key start
LH: loop header
LB: loop body
LE: loop exit
PB: predicated region body
PF: predicated region fallthrough
CT: control target
= control target key end

     0   :  { %s2726_s0 = inlined_call_operand.hbm [shape: f32[2,64,256], index: 0, kind: input, shape index: {}]   ;;  %s2727_s1 = inlined_call_operand.vmem [shape: bf16[64,128], index: 1, kind: input, shape index: {}]   ;;  %s2728_s2 = inlined_call_operand.vmem [shape: f32[1,128], index: 2, kind: input, shape index: {}]   ;;  %s2729_s3 = inlined_call_operand.vmem [shape: f32[1,128], index: 3, kind: input, shape index: {}]   ;;  %s2730_s4 = inlined_call_operand.hbm [shape: f32[1,128], index: 4, kind: input, shape index: {}]   ;;  %s2731_s5 = inlined_call_operand.vmem [shape: bf16[128,128], index: 5, kind: input, shape index: {}]   ;;  %s2732_s6 = inlined_call_operand.hbm [shape: f32[1,128], index: 6, kind: input, shape index: {}]   ;;  %s2733_s7 = inlined_call_operand.hbm [shape: f32[1,128], index: 7, kind: input, shape index: {}]   ;;  %s2734_s8 = inlined_call_operand.hbm [shape: f32[1,128], index: 8, kind: input, shape index: {}]   ;;  %s2735_s9 = inlined_call_operand.vmem [shape: bf16[128,64], index: 9, kind: input, shape index: {}]   ;;  %s2736_s10 = inlined_call_operand.vmem [shape: bf16[64,64], index: 10, kind: input, shape index: {}]   ;;  %s2737_s11 = inlined_call_operand.hbm [shape: f32[2,1,64], index: 11, kind: output, shape index: {0}]   ;;  %s2738_s12 = inlined_call_operand.hbm [shape: f32[2,1,64], index: 12, kind: output, shape index: {1}]   ;;  %s2739_s13 = inlined_call_operand.hbm [shape: f32[2,1,64], index: 13, kind: output, shape index: {2}]  }
   0x1   :  { %2751 = sst [smem:[#allocation24_spill]] %s2726_s0 }
   0x2   :  { %2752 = sst [smem:[#allocation25_spill]] %s2727_s1 }
   0x3   :  { %2753 = sst [smem:[#allocation26_spill]] %s2728_s2 }
   0x4   :  { %2754 = sst [smem:[#allocation27_spill]] %s2729_s3 }
   0x5   :  { %2755 = sst [smem:[#allocation28_spill]] %s2730_s4 }
   0x6   :  { %2756 = sst [smem:[#allocation29_spill]] %s2735_s9 }
   0x7   :  { %2757 = sst [smem:[#allocation30_spill]] %s2737_s11 }
   0x8   :  { %2758 = sst [smem:[#allocation31_spill]] %s2738_s12 }
   0x9   :  { %2759 = sst [smem:[#allocation32_spill]] %s2739_s13 }
   0xa   :  { %19 = vsyncpa [#allocation4], 0 }
   0xb   :  { %21 = vsyncpa [#allocation4 + $0x1], 0 }
   0xc   :  { %22 = vsyncpa [#allocation7], 0 }
   0xd   :  { %23 = vsyncpa [#allocation10], 0 }
   0xe   :  { %24 = vsyncpa [#allocation5], 0 }
   0xf   :  { %26 = vsyncpa [#allocation5 + $0x1], 0 }
  0x10   :  { %27 = vsyncpa [#allocation14], 0 }
  0x11   :  { %29 = vsyncpa [#allocation14 + $0x1], 0  ;;  %s2214_s25 = smov 0   ;;  %s2216_s26 = smov 0  }
  0x12   :  { %s2218_s27 = smov 0   ;;  %s2220_s28 = smov 0  }
  0x13   :  { %s2222_s29 = smov 0   ;;  %s2224_s30 = smov 0  }
  0x14 LB: > { %2760 = sst [smem:[#allocation21_spill]] %s2109_s25  ;;  %s2245_s14 = sadd.s32 4294967295, %s2129_s30   ;;  %s2129_s30 = sphi %s2224_s30, %s35_s30   ;;  %s2125_s29 = sphi %s2222_s29, %s2797_s29   ;;  %s2121_s28 = sphi %s2220_s28, %s2796_s28   ;;  %s2117_s27 = sphi %s2218_s27, %s2795_s27   ;;  %s2113_s26 = sphi %s2216_s26, %s2794_s26   ;;  %s2109_s25 = sphi %s2214_s25, %s2793_s25  }
  0x15   : > { %2761 = sst [smem:[#allocation22_spill]] %s2121_s28  ;;  %s2740_s15 = sadd.s32 4294967294, %s2129_s30  }
  0x16   : > { %p69_p0 = scmp.ne.s32.totalorder %s2113_s26, %s2109_s25  ;;  %p2746_p1 = scmp.eq.s32.totalorder %s2245_s14, 0 }
  0x17   : > { %p309_p3 = scmp.eq.s32.totalorder %s2740_s15, 1  ;;  %p1344_p5 = scmp.ge.s32.totalorder %s2129_s30, 1 }
  0x18   : > { %p2256_p4 = por %p2746_p1, %p69_p0  ;;  %p368_p7 = scmp.lt.s32.totalorder %s2129_s30, 3 }
  0x19   : > { %p2261_p6 = por %p309_p3, %p69_p0  ;;  %s2131_s19 = smov [#allocation6]  }
  0x1a   : > { %s2762_s16 = scalar_select %p2256_p4, 1, 0 }
  0x1b   : > { %s2763_s17 = scalar_select %p2261_p6, 1, 0 }
  0x1c   : > { %p2266_p8 = pnand %p1344_p5, %p368_p7  ;;  %s390_s20 = sshll.u32 %s2131_s19, 4  ;;  %s391_s20 = int_to_ptr.vmem [resolvable:$true] %s390_s20 }
  0x1d   : > { %2764 = sst [smem:[#allocation23_spill]] %s2763_s17  ;;  %s2132_s21 = smov [#allocation9]  }
  0x1e   : > { %s2765_s18 = scalar_select %p2266_p8, 1, 0 }
  0x1f   : > { %p1739_p10 = pneg %p2266_p8  ;;  %s415_s22 = sshll.u32 %s2132_s21, 4  ;;  %s2279_s22 = int_to_ptr.vmem [resolvable:$true] %s415_s22 }
  0x20   : > { %s2133_s24 = smov [#allocation8]   ;;  %s2767_s4 = sld [smem:[#allocation28_spill]] }
  0x21   : > { %p2275_p11 = pnand %p1739_p10, %p2746_p1  ;;  %s404_s15 = sshll.u32 %s2133_s24, 4  ;;  %s2281_s15 = int_to_ptr.vmem [resolvable:$true] %s404_s15 }
  0x23   : > { %p2291_p13 = pneg %p2275_p11 }
  0x26   : > { %s1837_s25 = scalar_lea.hbm %s2767_s4, 16 }
  0x27   : > { %p1838_p12 = scmp.ne.s32.totalorder %s2767_s4, %s1837_s25  ;;  %p1844_p5 = scmp.lt.u32.totalorder %s1837_s25, %s2767_s4 }
  0x29   : > { %p1840_p0 = pnand %p2291_p13, %p1838_p12 }
  0x2b   : > { %p1841_p3 = pneg %p1840_p0 }
  0x2d   : > { %p1846_p7 = pnand %p1844_p5, %p1841_p3 }
  0x2f   : > { %1849 = shalt.err (!%p1846_p7)
}
  0x30   : > { %s1850_s17 = scalar_lea.vmem %s391_s20, 16  ;;  %s1857_s11 = scalar_lea.vmem %s391_s20, 32 }
  0x31   : > { %p1851_p10 = scmp.ne.s32.totalorder %s391_s20, %s1850_s17  ;;  %p1858_p2 = scmp.lt.s32.totalorder %s391_s20, %s391_s20 }
  0x32   : > { %p1859_p6 = scmp.lt.s32.totalorder %s1857_s11, %s1850_s17 }
  0x33   : > { %p1853_p9 = pnand %p1851_p10, %p2291_p13 }
  0x34   : > { %p1860_p4 = por %p1859_p6, %p1858_p2 }
  0x35   : > { %p1854_p1 = pneg %p1853_p9 }
  0x37   : > { %p1861_p8 = pnand %p1860_p4, %p1854_p1 }
  0x39   : > { %1864 = shalt.err (!%p1861_p8)
}
  0x3a   : > { %1742 = dma.hbm_to_vmem [thread:$0]  (!%p2275_p11), %s2767_s4, 16, %s391_s20, [#allocation7]  }
  0x3b   : > { %s1865_s24 = scalar_lea.hbm %s2733_s7, 16 }
  0x3c   : > { %p1866_p9 = scmp.ne.s32.totalorder %s2733_s7, %s1865_s24  ;;  %p1872_p1 = scmp.lt.u32.totalorder %s1865_s24, %s2733_s7 }
  0x3e   : > { %p1868_p12 = pnand %p1866_p9, %p2291_p13 }
  0x40   : > { %p1869_p2 = pneg %p1868_p12 }
  0x42   : > { %p1874_p4 = pnand %p1872_p1, %p1869_p2 }
  0x44   : > { %1877 = shalt.err (!%p1874_p4)
}
  0x45   : > { %s1878_s20 = scalar_lea.vmem %s2279_s22, 16  ;;  %s1885_s9 = scalar_lea.vmem %s2279_s22, 32 }
  0x46   : > { %p1879_p6 = scmp.ne.s32.totalorder %s2279_s22, %s1878_s20  ;;  %p1886_p3 = scmp.lt.s32.totalorder %s2279_s22, %s2279_s22 }
  0x47   : > { %p1887_p5 = scmp.lt.s32.totalorder %s1885_s9, %s1878_s20 }
  0x48   : > { %p1881_p8 = pnand %p1879_p6, %p2291_p13 }
  0x49   : > { %p1888_p7 = por %p1887_p5, %p1886_p3 }
  0x4a   : > { %p1882_p0 = pneg %p1881_p8 }
  0x4c   : > { %p1889_p10 = pnand %p1888_p7, %p1882_p0 }
  0x4e   : > { %1892 = shalt.err (!%p1889_p10)
}
  0x4f   : > { %1748 = dma.hbm_to_vmem [thread:$0]  (!%p2275_p11), %s2733_s7, 16, %s2279_s22, [#allocation10]  }
  0x50   : > { %s1893_s25 = scalar_lea.hbm %s2732_s6, 16 }
  0x51   : > { %p1894_p9 = scmp.ne.s32.totalorder %s2732_s6, %s1893_s25  ;;  %p1900_p1 = scmp.lt.u32.totalorder %s1893_s25, %s2732_s6 }
  0x53   : > { %p1896_p12 = pnand %p1894_p9, %p2291_p13 }
  0x55   : > { %p1897_p2 = pneg %p1896_p12 }
  0x57   : > { %p1902_p4 = pnand %p1900_p1, %p1897_p2 }
  0x59   : > { %1905 = shalt.err (!%p1902_p4)
}
  0x5a   : > { %s1906_s22 = scalar_lea.vmem %s2281_s15, 16  ;;  %s1913_s9 = scalar_lea.vmem %s2281_s15, 32 }
  0x5b   : > { %p1907_p6 = scmp.ne.s32.totalorder %s2281_s15, %s1906_s22  ;;  %p1914_p3 = scmp.lt.s32.totalorder %s2281_s15, %s2281_s15 }
  0x5c   : > { %p1915_p5 = scmp.lt.s32.totalorder %s1913_s9, %s1906_s22 }
  0x5d   : > { %p1909_p8 = pnand %p1907_p6, %p2291_p13 }
  0x5e   : > { %p1916_p7 = por %p1915_p5, %p1914_p3 }
  0x5f   : > { %p1910_p0 = pneg %p1909_p8 }
  0x61   : > { %p1917_p10 = pnand %p1916_p7, %p1910_p0 }
  0x63   : > { %1920 = shalt.err (!%p1917_p10)
}
  0x64   : > { %1745 = dma.hbm_to_vmem [thread:$0]  (!%p2275_p11), %s2732_s6, 16, %s2281_s15, [#allocation7]  }
  0x65   : > { %s2134_s19 = smov [#allocation11]   ;;  %s1921_s17 = scalar_lea.hbm %s2734_s8, 16 }
  0x66   : > { %s426_s12 = sshll.u32 %s2134_s19, 4  ;;  %p1922_p9 = scmp.ne.s32.totalorder %s2734_s8, %s1921_s17  ;;  %s427_s12 = int_to_ptr.vmem [resolvable:$true] %s426_s12 }
  0x67   : > { %p1928_p1 = scmp.lt.u32.totalorder %s1921_s17, %s2734_s8 }
  0x68   : > { %p1924_p12 = pnand %p1922_p9, %p2291_p13 }
  0x6a   : > { %p1925_p2 = pneg %p1924_p12 }
  0x6c   : > { %p1930_p4 = pnand %p1928_p1, %p1925_p2 }
  0x6e   : > { %1933 = shalt.err (!%p1930_p4)
}
  0x6f   : > { %s1934_s15 = scalar_lea.vmem %s427_s12, 16  ;;  %s1941_s28 = scalar_lea.vmem %s427_s12, 32 }
  0x70   : > { %p1935_p6 = scmp.ne.s32.totalorder %s427_s12, %s1934_s15  ;;  %p1942_p3 = scmp.lt.s32.totalorder %s427_s12, %s427_s12 }
  0x71   : > { %p1943_p5 = scmp.lt.s32.totalorder %s1941_s28, %s1934_s15 }
  0x72   : > { %p1937_p8 = pnand %p1935_p6, %p2291_p13 }
  0x73   : > { %p1944_p7 = por %p1943_p5, %p1942_p3 }
  0x74   : > { %p1938_p0 = pneg %p1937_p8 }
  0x76   : > { %p1945_p10 = pnand %p1944_p7, %p1938_p0 }
  0x78   : > { %1948 = shalt.err (!%p1945_p10)
}
  0x79   : > { %1751 = dma.hbm_to_vmem [thread:$0]  (!%p2275_p11), %s2734_s8, 16, %s427_s12, [#allocation10]  }
  0x7a   : > { %s47_s21 = sadd.s32 1, %s2125_s29  ;;  %s56_s25 = sadd.s32 1, %s2117_s27 }
  0x7b   : > { %p49_p13 = scmp.ge.s32.totalorder %s47_s21, 2  ;;  %p63_p9 = scmp.ne.s32.totalorder %s2117_s27, %s2113_s26 }
  0x7c   : > { %p64_p12 = scmp.eq.s32.totalorder %s2129_s30, 0  ;;  %p1770_p2 = scmp.lt.s32.totalorder %s2129_s30, 2 }
  0x7d   : > { %s2799_s21 = smov (%p49_p13, %s47_s21), 0  ;;  %p2769_p4 = scmp.eq.s32.totalorder %s2245_s14, 1 }
  0x7e   : > { %p65_p1 = por %p64_p12, %p63_p9  ;;  %s51_s24 = ssub.s32 %s2125_s29, %s2799_s21 }
  0x7f   : > { %p2383_p6 = por %p2769_p4, %p63_p9  ;;  %s443_s17 = sand.u32 1, %s2117_s27  }
  0x80   : > { %p54_p8 = scmp.eq.s32.totalorder %s51_s24, 0  ;;  %s1350_s12 = sshll.u32 %s443_s17, 7 }
  0x81   : > { %s1366_s11 = sshll.u32 %s2125_s29, 11  ;;  %s2771_s0 = sld [smem:[#allocation24_spill]] }
  0x82   : > { %s2392_s20 = scalar_select %p54_p8, %s2117_s27, %s56_s25  }
  0x83   : > { %s447_s28 = scalar_lea.vmem [#allocation3], %s1350_s12  ;;  %p2401_p11 = pnand %p1770_p2, %p65_p1 }
  0x84   : > { %s456_s13 = sshll.u32 %s447_s28, 4  ;;  %s2407_s25 = scalar_lea.sflag [#allocation4], %s443_s17  ;;  %s2405_s13 = int_to_ptr.vmem [resolvable:$true] %s456_s13 }
  0x85   : > { %p1951_p3 = pneg %p2401_p11 }
  0x87   : > { %s2397_s15 = scalar_lea.hbm %s2771_s0, %s1366_s11  ;;  %s1954_s22 = scalar_lea.hbm %s2771_s0, 4096 }
  0x88   : > { %s1949_s24 = scalar_lea.hbm %s2397_s15, 2048  ;;  %p1955_p10 = scmp.lt.u32.totalorder %s2397_s15, %s2771_s0 }
  0x89   : > { %p1950_p0 = scmp.ne.s32.totalorder %s2397_s15, %s1949_s24  ;;  %p1956_p13 = scmp.lt.u32.totalorder %s1954_s22, %s1949_s24 }
  0x8a   : > { %p1958_p12 = scmp.lt.u32.totalorder %s1949_s24, %s2397_s15 }
  0x8b   : > { %p1952_p5 = pnand %p1951_p3, %p1950_p0  ;;  %p1957_p9 = por %p1956_p13, %p1955_p10 }
  0x8d   : > { %p1953_p7 = pneg %p1952_p5  ;;  %p1959_p2 = por %p1958_p12, %p1957_p9 }
  0x8f   : > { %p1960_p1 = pnand %p1959_p2, %p1953_p7 }
  0x91   : > { %1963 = shalt.err (!%p1960_p1)
}
  0x92   : > { %s1964_s17 = scalar_lea.vmem %s2405_s13, 2048  ;;  %s2135_s12 = smov [#allocation3]  }
  0x93   : > { %p1965_p4 = scmp.ne.s32.totalorder %s2405_s13, %s1964_s17  ;;  %s1969_s11 = sshll.u32 %s2135_s12, 4  ;;  %s1970_s11 = int_to_ptr.vmem [resolvable:$false] %s1969_s11 }
  0x94   : > { %s1971_s9 = scalar_lea.vmem %s1970_s11, 4096  ;;  %p1972_p5 = scmp.lt.s32.totalorder %s2405_s13, %s1970_s11 }
  0x95   : > { %p1967_p8 = pnand %p1965_p4, %p1951_p3  ;;  %p1973_p10 = scmp.lt.s32.totalorder %s1971_s9, %s1964_s17 }
  0x97   : > { %p1968_p0 = pneg %p1967_p8  ;;  %p1974_p13 = por %p1973_p10, %p1972_p5 }
  0x99   : > { %p1975_p9 = pnand %p1974_p13, %p1968_p0 }
  0x9b   : > { %1978 = shalt.err (!%p1975_p9)
}
  0x9c   : > { %s2136_s24 = smov 256   ;;  %s2137_s22 = smov 16  }
  0x9d   : > { %1755 = dma.hbm_to_vmem [thread:$0]  (!%p2401_p11), %s2397_s15, 2048, %s2405_s13, %s2407_s25, %s2136_s24, %s2136_s24, %s2137_s22  }
  0x9e   : > { %p2773_p3 = scmp.ne.s32.totalorder %s2765_s18, 0 }
  0x9f   : > { %s2438_s28 = sand.u32 (!%p2773_p3), 1, %s2113_s26   ;;  %p2774_p7 = scmp.ne.s32.totalorder (!%p2773_p3), %s2762_s16, 0 }
  0xa0   : > { %468 = sbr.rel (%p2773_p3) target bundleno = 1652 (0x674), region = 64  ;;  %s1354_s17 = sshll.u32 (!%p2773_p3), %s2438_s28, 7 }
  0xa1   : > { %s471_s12 = scalar_lea.sflag (!%p2773_p3), [#allocation4], %s2438_s28  ;;  %s2442_s11 = scalar_lea.vmem (!%p2773_p3), [#allocation3], %s1354_s17 }
  0xa7   : > { %2088 = dma.done.wait (%p2774_p7), %s471_s12, 2048  }
  0xa8   : > { %2090 = vsyncadd (%p2774_p7), %s471_s12, 4294965248  ;;  %p2775_p11 = scmp.eq.s32.totalorder %s2245_s14, 0 }
  0xaa   : > { %2092 = dma.done.wait (%p2775_p11), [#allocation7], 32   ;;  %p2776_p12 = pmov %p2775_p11 }
  0xab   : > { %p2777_p2 = pmov %p2775_p11 }
  0xac   : > { %2094 = vsyncadd (%p2776_p12), [#allocation7], 4294967264 }
  0xad   : > { %2096 = dma.done.wait (%p2777_p2), [#allocation10], 32   ;;  %p2778_p1 = pmov %p2777_p2 }
  0xae   : > { %v553_v0 = vld [vmem:[%s2442_s11] sm:$0xff]  ;;  %v561_v1 = vld [vmem:[%s2442_s11 + $0x8] sm:$0xff]  ;;  %v554_v5 = vld [vmem:[%s2442_s11 + $0x10] sm:$0xff]  ;;  %v2138_v24 = vmov 0.0|0.0   ;;  %s2779_s1 = sld [smem:[#allocation25_spill]]  ;;  %vm2139_vm0 = vmmov 0   ;;  %v661_v30 = vlaneseq }
  0xaf   : > { %2098 = vsyncadd (%p2778_p1), [#allocation10], 4294967264  ;;  %v555_v2 = vld [vmem:[%s2442_s11 + $0x20] sm:$0xff]  ;;  %v569_v3 = vadd.f32 %v561_v1, %v553_v0  ;;  %v563_v4 = vld [vmem:[%s2442_s11 + $0x28] sm:$0xff]  ;;  %1643 = vmatprep.subr.bf16.mxu0 %v2138_v24  ;;  %1655 = vmatprep.subr.bf16.mxu1 %v2138_v24  ;;  %v2140_v29 = vmov 0.0   ;;  %vm672_vm1 = vcmask 130112  }
  0xb0   : > { %v562_v6 = vld [vmem:[%s2442_s11 + $0x18] sm:$0xff]  ;;  %v571_v7 = vadd.f32 %v563_v4, %v555_v2  ;;  %v556_v8 = vld [vmem:[%s2442_s11 + $0x30] sm:$0xff]  ;;  %v557_v12 = vld [vmem:[%s2442_s11 + $0x40] sm:$0xff]  ;;  %1551 = vmatprep.mubr.msk.f32.mxu0 %vm2139_vm0, %v2140_v29  ;;  %1586 = vmatprep.mubr.msk.f32.mxu1 %vm2139_vm0, %v2140_v29  ;;  %v662_v31 = vand.u32 127, %v661_v30  ;;  %v664_v32 = vshrl.u32 %v661_v30, 7  ;;  %vm679_vm2 = vcmask 195712  }
  0xb1   : > { %v564_v9 = vld [vmem:[%s2442_s11 + $0x38] sm:$0xff]  ;;  %612 = vadd.xlane.f32.xlu0 %v569_v3  ;;  %v570_v10 = vadd.f32 %v562_v6, %v554_v5  ;;  %v565_v13 = vld [vmem:[%s2442_s11 + $0x48] sm:$0xff]  ;;  %v558_v14 = vld [vmem:[%s2442_s11 + $0x50] sm:$0xff]  ;;  %vm686_vm3 = vcmask 261312   ;;  %vm693_vm4 = vcmask 326912   ;;  %vm700_vm5 = vcmask 392512  }
  0xb2   : > { %616 = vadd.xlane.f32.xlu1 %v571_v7  ;;  %v572_v11 = vadd.f32 %v564_v9, %v556_v8  ;;  %v566_v15 = vld [vmem:[%s2442_s11 + $0x58] sm:$0xff]  ;;  %v573_v16 = vadd.f32 %v565_v13, %v557_v12  ;;  %v559_v18 = vld [vmem:[%s2442_s11 + $0x60] sm:$0xff]  ;;  %v567_v19 = vld [vmem:[%s2442_s11 + $0x68] sm:$0xff]  ;;  %v667_v33 = vadd.s32 4294967288, %v662_v31  ;;  %v674_v35 = vadd.s32 4294967280, %v662_v31  ;;  %s2780_s2 = sld [smem:[#allocation26_spill]] }
  0xb3   : > { %v574_v17 = vadd.f32 %v566_v15, %v558_v14  ;;  %v560_v20 = vld [vmem:[%s2442_s11 + $0x70] sm:$0xff]  ;;  %v568_v21 = vld [vmem:[%s2442_s11 + $0x78] sm:$0xff]  ;;  %v575_v22 = vadd.f32 %v567_v19, %v559_v18  ;;  %v681_v36 = vadd.s32 4294967272, %v662_v31  ;;  %v665_v38 = vsub.s32 %v662_v31, %v664_v32  ;;  %s2781_s3 = sld [smem:[#allocation27_spill]]  ;;  %s533_s16 = scalar_lea.vmem [#allocation13], %s2438_s28 }
  0xb4   : > { %v576_v23 = vadd.f32 %v568_v21, %v560_v20  ;;  %v1368_v25 = vld [vmem:[%s2779_s1] sm:$0xff]   ;;  %v1463_v26 = vld [vmem:[%s2779_s1 + $0x8] sm:$0xff]   ;;  %v1464_v27 = vld [vmem:[%s2779_s1 + $0x10] sm:$0xff]   ;;  %v670_v40 = vsub.s32 %v667_v33, %v664_v32  ;;  %v688_v41 = vadd.s32 4294967264, %v662_v31  ;;  %v677_v42 = vsub.s32 %v674_v35, %v664_v32  ;;  %s2782_s13 = sld [smem:[#allocation29_spill]]  ;;  %s2783_s22 = sld [smem:[#allocation22_spill]] }
  0xb5   : > { %614 = vadd.xlane.f32.xlu0 %v570_v10  ;;  %1645 = vmatpush3.bf16.msra.mxu0 %v1368_v25  ;;  %v1465_v28 = vld [vmem:[%s2779_s1 + $0x18] sm:$0xff]   ;;  %v684_v45 = vsub.s32 %v681_v36, %v664_v32  ;;  %v695_v46 = vadd.s32 4294967256, %v662_v31  ;;  %v702_v53 = vadd.s32 4294967248, %v662_v31  ;;  %v709_v58 = vadd.s32 4294967240, %v662_v31  ;;  %v1384_v20 = vld [vmem:[%s2731_s5] sm:$0xff]   ;;  %v1466_v21 = vld [vmem:[%s2731_s5 + $0x8] sm:$0xff]  }
  0xb6   : > { %618 = vadd.xlane.f32.xlu1 %v572_v11  ;;  %1646 = vmatprep.subr.bf16.mxu0 %v2138_v24  ;;  %v691_v52 = vsub.s32 %v688_v41, %v664_v32  ;;  %vm707_vm6 = vcmask 458112   ;;  %vm714_vm7 = vcmask 523712   ;;  %vm716_vm8 = vcmask 523264   ;;  %v1468_v30 = vld [vmem:[%s2731_s5 + $0x18] sm:$0xff]   ;;  %v1469_v31 = vld [vmem:[%s2731_s5 + $0x20] sm:$0xff]   ;;  %v1471_v33 = vld [vmem:[%s2731_s5 + $0x30] sm:$0xff]  }
  0xb7   : > { %v698_v57 = vsub.s32 %v695_v46, %v664_v32  ;;  %v705_v2 = vsub.s32 %v702_v53, %v664_v32  ;;  %v712_v5 = vsub.s32 %v709_v58, %v664_v32  ;;  %vm791_vm9 = vcmask 1040384   ;;  %1657 = vmatpush3.bf16.msra.mxu1 %v1384_v20  ;;  %v1470_v32 = vld [vmem:[%s2731_s5 + $0x28] sm:$0xff]   ;;  %v790_v41 = vld [vmem:[#allocation6] sm:$0x1]  ;;  %s1131_s17 = sand.u32 1, %s2245_s14   ;;  %s2784_s15 = sld [smem:[#allocation31_spill]] }
  0xb8   : > { %v652_v15 = vld [vmem:[%s2780_s2] sm:$0x1]  ;;  %1658 = vmatprep.subr.bf16.mxu1 %v2138_v24  ;;  %vm1122_vm11 = vcmask 516096   ;;  %s1161_s25 = sshll.u32 %s533_s16, 4  ;;  %s2612_s9 = scalar_lea.sflag [#allocation14], %s1131_s17  ;;  %s1162_s25 = int_to_ptr.vmem [resolvable:$true] %s1161_s25 }
  0xb9   : > { %620 = vadd.xlane.f32.xlu0 %v573_v16  ;;  %1648 = vmatpush3.bf16.msra.mxu0 %v1463_v26  ;;  %s1979_s24 = scalar_lea.vmem %s1162_s25, 16  ;;  %s2141_s0 = smov [#allocation13]  }
  0xba   : > { %622 = vadd.xlane.f32.xlu1 %v574_v17  ;;  %1649 = vmatprep.subr.bf16.mxu0 %v2138_v24  ;;  %s2602_s12 = sshll.u32 %s2783_s22, 4  ;;  %p1980_p4 = scmp.ne.s32.totalorder %s1162_s25, %s1979_s24 }
  0xbb   : > { %1660 = vmatpush3.bf16.msra.mxu1 %v1466_v21  ;;  %s1983_s14 = sshll.u32 %s2141_s0, 4  ;;  %s1984_s14 = int_to_ptr.vmem [resolvable:$false] %s1983_s14 }
  0xbc   : > { %1661 = vmatprep.subr.bf16.mxu1 %v2138_v24  ;;  %p1981_p8 = pnand %p1980_p4, %p2383_p6  ;;  %s1985_s22 = scalar_lea.vmem %s1984_s14, 32 }
  0xbd   : > { %624 = vadd.xlane.f32.xlu0 %v575_v22  ;;  %1651 = vmatpush3.bf16.msra.mxu0 %v1464_v27  ;;  %s2608_s19 = scalar_lea.hbm %s2784_s15, %s2602_s12  ;;  %p1986_p5 = scmp.lt.s32.totalorder %s1162_s25, %s1984_s14 }
  0xbe   : > { %626 = vadd.xlane.f32.xlu1 %v576_v23  ;;  %1652 = vmatprep.subr.bf16.mxu0 %v2138_v24  ;;  %p1982_p0 = pneg %p1981_p8  ;;  %p1987_p10 = scmp.lt.s32.totalorder %s1985_s22, %s1979_s24 }
  0xc0   : > { %p1988_p13 = por %p1987_p10, %p1986_p5 }
  0xc1   : > { %1654 = vmatpush3.bf16.msra.mxu0 %v1465_v28  ;;  %v1467_v28 = vld [vmem:[%s2731_s5 + $0x10] sm:$0xff]  }
  0xc2   : > { %1679 = vmatprep.subr.bf16.mxu0 %v2138_v24  ;;  %1663 = vmatpush3.bf16.msra.mxu1 %v1467_v28  ;;  %p1989_p9 = pnand %p1988_p13, %p1982_p0 }
  0xc3   : > { %1664 = vmatprep.subr.bf16.mxu1 %v2138_v24 }
  0xc6   : > { %1666 = vmatpush3.bf16.msra.mxu1 %v1468_v30 }
  0xc7   : > { %1667 = vmatprep.subr.bf16.mxu1 %v2138_v24 }
  0xca   : > { %1669 = vmatpush3.bf16.msra.mxu1 %v1469_v31 }
  0xcb   : > { %1670 = vmatprep.subr.bf16.mxu1 %v2138_v24 }
  0xce   : > { %1672 = vmatpush3.bf16.msra.mxu1 %v1470_v32 }
  0xcf   : > { %1673 = vmatprep.subr.bf16.mxu1 %v2138_v24 }
  0xd2   : > { %1675 = vmatpush3.bf16.msra.mxu1 %v1471_v33 }
  0xd3   : > { %1676 = vmatprep.subr.bf16.mxu1 %v2138_v24 }
 0x13e   : > { %v613_v34 = vpop.xlane.xlu0 %612 }
 0x13f   : > { %v617_v37 = vpop.xlane.xlu1 %616  ;;  %v628_v39 = vmul.f32 0.00390625, %v613_v34  ;;  %v1472_v34 = vld [vmem:[%s2731_s5 + $0x38] sm:$0xff]  }
 0x140   : > { %v630_v43 = vmul.f32 0.00390625, %v617_v37  ;;  %1678 = vmatpush3.bf16.msra.mxu1 %v1472_v34 }
 0x141   : > { %v666_v50 = vrot.slane %v628_v39, %v665_v38  ;;  %1703 = vmatprep.subr.bf16.mxu1 %v2138_v24  ;;  %v789_v39 = vld [vmem:[%s2781_s3] sm:$0x1] }
 0x142   : > { %v615_v44 = vpop.xlane.xlu0 %614  ;;  %v678_v54 = vrot.slane %v630_v43, %v677_v42 }
 0x143   : > { %v629_v47 = vmul.f32 0.00390625, %v615_v44  ;;  %v619_v48 = vpop.xlane.xlu1 %618 }
 0x144   : > { %v631_v49 = vmul.f32 0.00390625, %v619_v48  ;;  %v1481_v48 = vld [vmem:[%s2736_s10 + $0x10] sm:$0xff]  }
 0x145   : > { %v671_v51 = vrot.slane %v629_v47, %v670_v40  ;;  %v1480_v47 = vld [vmem:[%s2736_s10 + $0x8] sm:$0xff]  }
 0x146   : > { %v685_v55 = vrot.slane %v631_v49, %v684_v45  ;;  %v621_v56 = vpop.xlane.xlu0 %620  ;;  %v1448_v45 = vld [vmem:[%s2736_s10] sm:$0xff]  }
 0x147   : > { %v673_v59 = vsel %vm672_vm1, %v671_v51, %v666_v50  ;;  %v632_v60 = vmul.f32 0.00390625, %v621_v56  ;;  %v623_v61 = vpop.xlane.xlu1 %622  ;;  %v843_v49 = vld [vmem:[#allocation8] sm:$0x1] }
 0x148   : > { %v680_v62 = vsel %vm679_vm2, %v678_v54, %v673_v59  ;;  %v633_v63 = vmul.f32 0.00390625, %v623_v61  ;;  %v1416_v56 = vld [vmem:[%s2782_s13] sm:$0xff]  }
 0x149   : > { %v687_v0 = vsel %vm686_vm3, %v685_v55, %v680_v62  ;;  %v692_v1 = vrot.slane %v632_v60, %v691_v52 }
 0x14a   : > { %v699_v3 = vrot.slane %v633_v63, %v698_v57  ;;  %v625_v4 = vpop.xlane.xlu0 %624  ;;  %v1473_v57 = vld [vmem:[%s2782_s13 + $0x8] sm:$0xff]   ;;  %v1474_v63 = vld [vmem:[%s2782_s13 + $0x10] sm:$0xff]  }
 0x14b   : > { %v694_v6 = vsel %vm693_vm4, %v692_v1, %v687_v0  ;;  %v634_v7 = vmul.f32 0.00390625, %v625_v4  ;;  %v627_v8 = vpop.xlane.xlu1 %626  ;;  %v1475_v0 = vld [vmem:[%s2782_s13 + $0x18] sm:$0xff]   ;;  %v1476_v1 = vld [vmem:[%s2782_s13 + $0x20] sm:$0xff]  }
 0x14c   : > { %v635_v9 = vmul.f32 0.00390625, %v627_v8  ;;  %v701_v11 = vsel %vm700_vm5, %v699_v3, %v694_v6  ;;  %v1478_v3 = vld [vmem:[%s2782_s13 + $0x30] sm:$0xff]   ;;  %v1479_v4 = vld [vmem:[%s2782_s13 + $0x38] sm:$0xff]  }
 0x14d   : > { %v706_v10 = vrot.slane %v634_v7, %v705_v2  ;;  %v1477_v2 = vld [vmem:[%s2782_s13 + $0x28] sm:$0xff]  }
 0x14e   : > { %v713_v12 = vrot.slane %v635_v9, %v712_v5  ;;  %v914_v9 = vld [vmem:[#allocation9] sm:$0x1] }
 0x14f   : > { %v708_v13 = vsel %vm707_vm6, %v706_v10, %v701_v11  ;;  %v915_v11 = vld [vmem:[#allocation11] sm:$0x1] }
 0x150   : > { %v2495_v14 = vsel %vm714_vm7, %v713_v12, %v708_v13 }
 0x151   : > { %1552 = vmatmul.mubr.msk.f32.vlgmr.msra.gmra.mrb[0].mxu0 %vm716_vm8, %v2495_v14 }
 0x152   : > { %1621 = vmatprep.mubr.msk.f32.mxu0 %vm2139_vm0, %v2140_v29  ;;  %1681 = vmatpush3.bf16.msra.mxu0 %v1416_v56 }
 0x153   : > { %1682 = vmatprep.subr.bf16.mxu0 %v2138_v24 }
 0x156   : > { %1684 = vmatpush3.bf16.msra.mxu0 %v1473_v57 }
 0x157   : > { %1685 = vmatprep.subr.bf16.mxu0 %v2138_v24 }
 0x15a   : > { %1687 = vmatpush3.bf16.msra.mxu0 %v1474_v63 }
 0x15b   : > { %1688 = vmatprep.subr.bf16.mxu0 %v2138_v24 }
 0x15e   : > { %1690 = vmatpush3.bf16.msra.mxu0 %v1475_v0 }
 0x15f   : > { %1691 = vmatprep.subr.bf16.mxu0 %v2138_v24 }
 0x162   : > { %1693 = vmatpush3.bf16.msra.mxu0 %v1476_v1 }
 0x163   : > { %1694 = vmatprep.subr.bf16.mxu0 %v2138_v24 }
 0x166   : > { %1696 = vmatpush3.bf16.msra.mxu0 %v1477_v2 }
 0x167   : > { %1697 = vmatprep.subr.bf16.mxu0 %v2138_v24 }
 0x16a   : > { %1699 = vmatpush3.bf16.msra.mxu0 %v1478_v3 }
 0x16b   : > { %1700 = vmatprep.subr.bf16.mxu0 %v2138_v24 }
 0x16e   : > { %1702 = vmatpush3.bf16.msra.mxu0 %v1479_v4 }
 0x224   : > { %v785_v16 = vpop.f32.mrb[0].mxu0 }
 0x225   : > { %v786_v17 = vadd.f32 %v785_v16, %v652_v15  ;;  %v1553_v18 = vpop.f32.mrb[1].mxu0 }
 0x227   : > { %v792_v19 = vsel %vm791_vm9, %v786_v17, 0.0 }
 0x228   : > { %793 = vadd.xlane.f32.xlu0 %v792_v19 }
 0x2b5   : > { %v794_v22 = vpop.xlane.xlu0 %793 }
 0x2b6   : > { %v796_v23 = vmul.f32 0.0078125, %v794_v22 }
 0x2b8   : > { %v797_v25 = vsub.f32 %v786_v17, %v796_v23 }
 0x2ba   : > { %v798_v26 = vmul.f32 %v797_v25, %v797_v25 }
 0x2bc   : > { %v799_v27 = vsel %vm791_vm9, %v798_v26, 0.0 }
 0x2bd   : > { %800 = vadd.xlane.f32.xlu1 %v799_v27 }
 0x34a   : > { %v801_v35 = vpop.xlane.xlu1 %800 }
 0x34b   : > { %v802_v36 = vmul.f32 0.0078125, %v801_v35 }
 0x34d   : > { %v803_v37 = vadd.f32 1e-05, %v802_v36 }
 0x34f   : > { %1833 = vrsqrt.f32 %v803_v37 }
 0x359   : > { %v1834_v38 = vpop.eup %1833 }
 0x35a   : > { %v805_v40 = vmul.f32 %v1834_v38, %v797_v25 }
 0x35c   : > { %v806_v42 = vmul.f32 %v805_v40, %v789_v39 }
 0x35e   : > { %v807_v43 = vadd.f32 %v806_v42, %v790_v41 }
 0x360   : > { %vm808_vm10 = vcmp.gt.f32.partialorder %v807_v43, 0.0  ;;  %v809_v44 = vmul.f32 0.1, %v807_v43 }
 0x362   : > { %v810_v46 = vsel %vm808_vm10, %v807_v43, %v809_v44 }
 0x363   : > { %1587 = vmatmul.mubr.f32.vlgmr.msra.gmra.mrb[0].mxu1 %v810_v46 }
 0x364   : > { %1705 = vmatpush3.bf16.msra.mxu1 %v1448_v45  ;;  %1640 = vmatprep.mubr.msk.f32.mxu1 %vm2139_vm0, %v2140_v29  ;;  %v1482_v29 = vld [vmem:[%s2736_s10 + $0x18] sm:$0xff]  }
 0x365   : > { %1706 = vmatprep.subr.bf16.mxu1 %v2138_v24 }
 0x368   : > { %1708 = vmatpush3.bf16.msra.mxu1 %v1480_v47 }
 0x369   : > { %1709 = vmatprep.subr.bf16.mxu1 %v2138_v24 }
 0x36c   : > { %1711 = vmatpush3.bf16.msra.mxu1 %v1481_v48 }
 0x36d   : > { %1712 = vmatprep.subr.bf16.mxu1 %v2138_v24 }
 0x370   : > { %1714 = vmatpush3.bf16.msra.mxu1 %v1482_v29 }
 0x373   : > { %1641 = vmatmul.mubr.msk.f32.vlgmr.msra.gmra.mrb[2].mxu1 %vm716_vm8, %v2495_v14 }
 0x436   : > { %v910_v50 = vpop.f32.mrb[0].mxu1 }
 0x437   : > { %v911_v51 = vadd.f32 %v910_v50, %v843_v49  ;;  %v1588_v52 = vpop.f32.mrb[1].mxu1 }
 0x439   : > { %v916_v53 = vsel %vm791_vm9, %v911_v51, 0.0 }
 0x43a   : > { %917 = vadd.xlane.f32.xlu0 %v916_v53 }
 0x446   : > { %v2561_v54 = vpop.f32.mrb[2].mxu1 }
 0x447   : > { %1124 = vst.msk [vmem:[%s533_s16] sm:$0x1] %vm1122_vm11, %v2561_v54  ;;  %v1642_v55 = vpop.f32.mrb[3].mxu1 }
 0x4c7   : > { %v918_v58 = vpop.xlane.xlu0 %917 }
 0x4c8   : > { %v919_v59 = vmul.f32 0.0078125, %v918_v58 }
 0x4ca   : > { %v920_v60 = vsub.f32 %v911_v51, %v919_v59 }
 0x4cc   : > { %v921_v61 = vmul.f32 %v920_v60, %v920_v60 }
 0x4ce   : > { %v922_v62 = vsel %vm791_vm9, %v921_v61, 0.0 }
 0x4cf   : > { %923 = vadd.xlane.f32.xlu1 %v922_v62 }
 0x55c   : > { %v924_v5 = vpop.xlane.xlu1 %923 }
 0x55d   : > { %v925_v6 = vmul.f32 0.0078125, %v924_v5 }
 0x55f   : > { %v926_v7 = vadd.f32 1e-05, %v925_v6 }
 0x561   : > { %1835 = vrsqrt.f32 %v926_v7 }
 0x56b   : > { %v1836_v8 = vpop.eup %1835 }
 0x56c   : > { %v928_v10 = vmul.f32 %v1836_v8, %v920_v60 }
 0x56e   : > { %v929_v12 = vmul.f32 %v928_v10, %v914_v9 }
 0x570   : > { %v930_v13 = vadd.f32 %v929_v12, %v915_v11 }
 0x572   : > { %vm931_vm12 = vcmp.gt.f32.partialorder %v930_v13, 0.0  ;;  %v932_v24 = vmul.f32 0.1, %v930_v13 }
 0x574   : > { %v933_v14 = vsel %vm931_vm12, %v930_v13, %v932_v24 }
 0x575   : > { %1622 = vmatmul.mubr.f32.vlgmr.msra.gmra.mrb[2].mxu0 %v933_v14 }
 0x576   : > { %1992 = shalt.err (!%p1989_p9)
}
 0x577   : > { %s1993_s16 = scalar_lea.hbm %s2608_s19, 16  ;;  %s1997_s0 = scalar_lea.hbm %s2784_s15, 32 }
 0x578   : > { %p1994_p3 = scmp.ne.s32.totalorder %s2608_s19, %s1993_s16  ;;  %p1998_p12 = scmp.lt.u32.totalorder %s2608_s19, %s2784_s15 }
 0x579   : > { %p1999_p2 = scmp.lt.u32.totalorder %s1997_s0, %s1993_s16  ;;  %p2001_p4 = scmp.lt.u32.totalorder %s1993_s16, %s2608_s19 }
 0x57a   : > { %p1995_p7 = pnand %p1994_p3, %p2383_p6 }
 0x57b   : > { %p2000_p1 = por %p1999_p2, %p1998_p12 }
 0x57c   : > { %p1996_p11 = pneg %p1995_p7 }
 0x57d   : > { %p2002_p8 = por %p2001_p4, %p2000_p1 }
 0x57f   : > { %p2003_p0 = pnand %p2002_p8, %p1996_p11 }
 0x581   : > { %2006 = shalt.err (!%p2003_p0)
}
 0x582   : > { %1734 = dma.vmem_to_hbm [thread:$0]  (%p2383_p6), %s1162_s25, 16, %s2608_s19, %s2612_s9  }
 0x583   : > { %s527_s24 = scalar_lea.vmem [#allocation12], %s2438_s28  ;;  %s2750_s17 = scalar_lea.vmem [#allocation15], %s2438_s28 }
 0x584   : > { %s1148_s22 = sshll.u32 %s527_s24, 4  ;;  %s1174_s16 = sshll.u32 %s2750_s17, 4  ;;  %s2642_s22 = int_to_ptr.vmem [resolvable:$true] %s1148_s22  ;;  %s2652_s16 = int_to_ptr.vmem [resolvable:$true] %s1174_s16 }
 0x585   : > { %s2785_s18 = sld [smem:[#allocation30_spill]]  ;;  %s2786_s1 = sld [smem:[#allocation32_spill]] }
 0x586   : > { %s1128_s11 = scalar_lea.sflag [#allocation5], %s2438_s28  ;;  %s2007_s0 = scalar_lea.vmem %s2642_s22, 16 }
 0x587   : > { %p2008_p5 = scmp.ne.s32.totalorder %s2642_s22, %s2007_s0  ;;  %s2142_s2 = smov [#allocation12]  }
 0x588   : > { %s2011_s3 = sshll.u32 %s2142_s2, 4  ;;  %s2012_s3 = int_to_ptr.vmem [resolvable:$false] %s2011_s3 }
 0x589   : > { %p2009_p10 = pnand %p2008_p5, %p2383_p6  ;;  %p2014_p9 = scmp.lt.s32.totalorder %s2642_s22, %s2012_s3 }
 0x58b   : > { %s2640_s14 = scalar_lea.hbm %s2785_s18, %s2602_s12  ;;  %s2650_s17 = scalar_lea.hbm %s2786_s1, %s2602_s12 }
 0x58c   : > { %p2010_p13 = pneg %p2009_p10 }
 0x648   : > { %v1032_v15 = vpop.f32.mrb[2].mxu0 }
 0x649   : > { %1123 = vst.msk [vmem:[%s527_s24] sm:$0x1] %vm1122_vm11, %v1032_v15  ;;  %v1125_v16 = vadd.f32 %v2561_v54, %v1032_v15  ;;  %v1623_v17 = vpop.f32.mrb[3].mxu0  ;;  %s2013_s24 = scalar_lea.vmem %s2012_s3, 32 }
 0x64a   : > { %p2015_p3 = scmp.lt.s32.totalorder %s2013_s24, %s2007_s0 }
 0x64c   : > { %p2016_p7 = por %p2015_p3, %p2014_p9 }
 0x64e   : > { %p2017_p11 = pnand %p2016_p7, %p2010_p13 }
 0x650   : > { %2020 = shalt.err (!%p2017_p11)
}
 0x651   : > { %s2021_s12 = scalar_lea.hbm %s2640_s14, 16  ;;  %s2025_s2 = scalar_lea.hbm %s2785_s18, 32 }
 0x652   : > { %p2022_p12 = scmp.ne.s32.totalorder %s2640_s14, %s2021_s12  ;;  %p2026_p4 = scmp.lt.u32.totalorder %s2640_s14, %s2785_s18 }
 0x653   : > { %p2027_p8 = scmp.lt.u32.totalorder %s2025_s2, %s2021_s12  ;;  %p2029_p5 = scmp.lt.u32.totalorder %s2021_s12, %s2640_s14 }
 0x654   : > { %p2023_p2 = pnand %p2022_p12, %p2383_p6 }
 0x655   : > { %p2028_p0 = por %p2027_p8, %p2026_p4 }
 0x656   : > { %p2024_p1 = pneg %p2023_p2 }
 0x657   : > { %p2030_p10 = por %p2029_p5, %p2028_p0 }
 0x659   : > { %p2031_p13 = pnand %p2030_p10, %p2024_p1 }
 0x65b   : > { %2034 = shalt.err (!%p2031_p13)
}
 0x65c   : > { %1733 = dma.vmem_to_hbm [thread:$0]  (%p2383_p6), %s2642_s22, 16, %s2640_s14, %s1128_s11  }
 0x65d   : > { %s2787_s0 = scalar_lea.vmem [#allocation15], %s2438_s28  ;;  %s2035_s4 = scalar_lea.vmem %s2652_s16, 16 }
 0x65e   : > { %1126 = vst.msk [vmem:[%s2787_s0] sm:$0x1] %vm1122_vm11, %v1125_v16  ;;  %p2036_p9 = scmp.ne.s32.totalorder %s2652_s16, %s2035_s4  ;;  %s2143_s24 = smov [#allocation15]  }
 0x65f   : > { %s2039_s12 = sshll.u32 %s2143_s24, 4  ;;  %s2040_s12 = int_to_ptr.vmem [resolvable:$false] %s2039_s12 }
 0x660   : > { %p2037_p3 = pnand %p2036_p9, %p2383_p6  ;;  %s2041_s19 = scalar_lea.vmem %s2040_s12, 32 }
 0x661   : > { %p2042_p11 = scmp.lt.s32.totalorder %s2652_s16, %s2040_s12  ;;  %p2043_p12 = scmp.lt.s32.totalorder %s2041_s19, %s2035_s4 }
 0x662   : > { %p2038_p7 = pneg %p2037_p3 }
 0x663   : > { %p2044_p2 = por %p2043_p12, %p2042_p11 }
 0x665   : > { %p2045_p1 = pnand %p2044_p2, %p2038_p7 }
 0x667   : > { %2048 = shalt.err (!%p2045_p1)
}
 0x668   : > { %s2049_s28 = scalar_lea.hbm %s2650_s17, 16  ;;  %s2053_s11 = scalar_lea.hbm %s2786_s1, 32 }
 0x669   : > { %p2050_p4 = scmp.ne.s32.totalorder %s2650_s17, %s2049_s28  ;;  %p2054_p5 = scmp.lt.u32.totalorder %s2650_s17, %s2786_s1 }
 0x66a   : > { %p2055_p10 = scmp.lt.u32.totalorder %s2053_s11, %s2049_s28  ;;  %p2057_p9 = scmp.lt.u32.totalorder %s2049_s28, %s2650_s17 }
 0x66b   : > { %p2051_p8 = pnand %p2050_p4, %p2383_p6 }
 0x66c   : > { %p2056_p13 = por %p2055_p10, %p2054_p5 }
 0x66d   : > { %p2052_p0 = pneg %p2051_p8 }
 0x66e   : > { %p2058_p3 = por %p2057_p9, %p2056_p13 }
 0x670   : > { %p2059_p7 = pnand %p2058_p3, %p2052_p0 }
 0x672   : > { %2062 = shalt.err (!%p2059_p7)
}
 0x673   : > { %1735 = dma.vmem_to_hbm [thread:$0]  (%p2383_p6), %s2652_s16, 16, %s2650_s17, %s2612_s9  }
 0x674 PF: > { %s2788_s3 = sld [smem:[#allocation21_spill]]  ;;  %s2789_s0 = sld [smem:[#allocation23_spill]] }
 0x675   : > { %p2791_p12 = scmp.ge.s32.totalorder %s2129_s30, 2 }
 0x67a   : > { %s1186_s4 = sand.u32 1, %s2788_s3   ;;  %p2790_p11 = scmp.ne.s32.totalorder %s2789_s0, 0 }
 0x67b   : > { %s1187_s24 = scalar_lea.sflag [#allocation5], %s1186_s4 }
 0x67c   : > { %p1757_p2 = pnand %p2791_p12, %p2790_p11 }
 0x67e   : > { %2100 = dma.done.wait (!%p1757_p2), %s1187_s24, 16  }
 0x67f   : > { %2102 = vsyncadd (!%p1757_p2), %s1187_s24, 4294967280  ;;  %s2792_s12 = sadd.s32 4294967294, %s2129_s30  }
 0x680   : > { %s1194_s19 = sand.u32 1, %s2792_s12  }
 0x681   : > { %s1195_s28 = scalar_lea.sflag [#allocation14], %s1194_s19 }
 0x682   : > { %2104 = dma.done.wait (!%p1757_p2), %s1195_s28, 32  }
 0x683   : > { %2106 = vsyncadd (!%p1757_p2), %s1195_s28, 4294967264  ;;  %s35_s30 = sadd.s32 1, %s2129_s30   ;;  %s2793_s25 = smov %s2113_s26 }
 0x684   : > { %p32_p6 = scmp.ge.s32.totalorder %s35_s30, 4   ;;  %s2794_s26 = smov %s2117_s27 }
 0x685   : > { %s2795_s27 = smov %s2392_s20  ;;  %s2796_s28 = smov %s2125_s29 }
 0x686   : > { %s2797_s29 = smov %s2799_s21  ;;  %34 = sbr.rel (!%p32_p6) target bundleno = 20 (0x14), region = 165 }
 0x68d   :  { %1207 = vsyncpa [#allocation4], 1 }
 0x68e   :  { %1209 = vsyncpa [#allocation4 + $0x1], 1 }
 0x68f   :  { %1210 = vsyncpa [#allocation7], 1 }
 0x690   :  { %1211 = vsyncpa [#allocation10], 1 }
 0x691   :  { %1212 = vsyncpa [#allocation5], 1 }
 0x692   :  { %1214 = vsyncpa [#allocation5 + $0x1], 1 }
 0x693   :  { %1215 = vsyncpa [#allocation14], 1 }
 0x694   :  { %1217 = vsyncpa [#allocation14 + $0x1], 1 }

</bundles_post_ra>
